<compile_context>
chip_gen: v7x
topology: tpu7x:2x2x1
jax: 0.10.0
libtpu: 0.0.40
codegen_flags: <defaults>
</compile_context>

<pallas_src>
import math

import jax
import jax.numpy as jnp
from jax import lax
from jax.experimental import pallas as pl
from jax.experimental.pallas import tpu as pltpu

IN_FEATURES = 128
OUT_CHS = 64          # matches Basic_Transformer default
N_TOKENS = 8          # small "sequence" length for the demo
LANE = 128
CPAD = 128            # out_chs padded to full lane width


def _round_up(a, b):
    return ((a + b - 1) // b) * b


def prepare_qkv_weights(wq, wk, wv, out_chs=OUT_CHS):
    """One-time weight prep (init time): transpose to x@W layout, fold the
    1/sqrt(out_chs) softmax scale into Wq, zero-pad each projection to 128
    output lanes, cast to bf16.  Returns (w_q, w_kv):
      w_q : (128, CPAD)      = [Wq * scale | 0]
      w_kv: (128, 2*CPAD)    = [Wk | 0 | Wv | 0]
    """
    scale = 1.0 / math.sqrt(out_chs)

    def pad_cols(w_t):  # (128, C) -> (128, CPAD)
        return jnp.pad(w_t, ((0, 0), (0, CPAD - w_t.shape[1])))

    w_q = pad_cols(wq.T * scale).astype(jnp.bfloat16)
    w_kv = jnp.concatenate(
        [pad_cols(wk.T), pad_cols(wv.T)], axis=1).astype(jnp.bfloat16)
    return w_q, w_kv


def _transformer_kernel(n_ref, xq_ref, xkv_ref, wq_ref, wkv_ref,
                        qk_ref, out_ref):
    # n_ref:   SMEM (1,) int32 scalar-prefetch -> number of real tokens
    # xq_ref:  (tq, 128) bf16   query rows of this grid step
    # xkv_ref: (nk, 128) bf16   all (padded) key/value rows
    # wq_ref:  (128, CPAD) bf16 [Wq*scale | 0]
    # wkv_ref: (128, 2*CPAD) bf16 [Wk | 0 | Wv | 0]
    n_real = n_ref[0]

    xq = xq_ref[...]
    xkv = xkv_ref[...]

    # Split projection: Q only over the query tile, K/V over all key rows.
    # bf16 MXU operands, f32 accumulation.
    q = jnp.dot(xq, wq_ref[...], preferred_element_type=jnp.float32)     # (tq, CPAD)
    kv = jnp.dot(xkv, wkv_ref[...], preferred_element_type=jnp.float32)  # (nk, 2*CPAD)
    k = kv[:, :CPAD]          # lane-aligned slices (no layout shuffle)
    v = kv[:, CPAD:]

    # scores = q @ k^T via transposed contraction (no materialized transpose).
    # bf16 operands -> ~3x fewer MXU passes than f32xf32; f32 accumulation.
    scores = lax.dot_general(q.astype(jnp.bfloat16), k.astype(jnp.bfloat16),
                             (((1,), (1,)), ((), ())),
                             preferred_element_type=jnp.float32)          # (tq, nk)

    # Mask padded key columns, then numerically-stable softmax in f32.
    # (If n_real were 0 the math degrades to a uniform row, not NaN.)
    col = lax.broadcasted_iota(jnp.int32, scores.shape, 1)
    scores = jnp.where(col < n_real, scores, jnp.float32(-1e30))
    m = jnp.max(scores, axis=1, keepdims=True)
    e = jnp.exp(scores - m)
    denom = jnp.sum(e, axis=1, keepdims=True)
    # EUP vrcp (approx) keeps the VPU slot free; error is within the bf16-level
    # tolerance budget of the returned probabilities.
    probs = e * pl.reciprocal(denom, approx=True)

    # Lane-dense full-block stores; wrapper slices the valid region.
    qk_ref[...] = probs.astype(qk_ref.dtype)                              # (tq, nk)
    out_ref[...] = jnp.dot(probs.astype(jnp.bfloat16), v.astype(jnp.bfloat16),
                           preferred_element_type=jnp.float32
                           ).astype(out_ref.dtype)                        # (tq, CPAD)


def basic_transformer(x, w_q, w_kv):
    """x: (N, 128) float; (w_q, w_kv): output of prepare_qkv_weights()."""
    n, d = x.shape
    assert d == IN_FEATURES

    # Query-row tiling: one tile for small N, 128-row tiles for larger N.
    nq8 = _round_up(n, 8)
    if nq8 <= 128:
        tq, nq = nq8, nq8
    else:
        tq = 128
        nq = _round_up(n, tq)
    nk = _round_up(n, LANE)    # lane-aligned key rows -> lane-dense qk output

    # Pad the token axis once (zero rows); padded keys are masked in-kernel.
    x_pad = jnp.pad(x, ((0, nk - n), (0, 0))).astype(jnp.bfloat16)
    n_real = jnp.array([n], dtype=jnp.int32)

    qk_pad, out_pad = pl.pallas_call(
        _transformer_kernel,
        out_shape=(
            jax.ShapeDtypeStruct((nq, nk), jnp.float32),
            jax.ShapeDtypeStruct((nq, CPAD), jnp.float32),
        ),
        grid_spec=pltpu.PrefetchScalarGridSpec(
            num_scalar_prefetch=1,
            grid=(nq // tq,),
            in_specs=[
                # query-row tile of x (only these rows feed the Q projection)
                pl.BlockSpec((tq, IN_FEATURES), lambda i, n_ref: (i, 0)),
                # full (padded) x for the K/V projection
                pl.BlockSpec((nk, IN_FEATURES), lambda i, n_ref: (0, 0)),
                pl.BlockSpec((IN_FEATURES, CPAD), lambda i, n_ref: (0, 0)),
                pl.BlockSpec((IN_FEATURES, 2 * CPAD), lambda i, n_ref: (0, 0)),
            ],
            out_specs=(
                pl.BlockSpec((tq, nk), lambda i, n_ref: (i, 0)),
                pl.BlockSpec((tq, CPAD), lambda i, n_ref: (i, 0)),
            ),
        ),
        compiler_params=pltpu.CompilerParams(
            # q tiles are independent -> shard across v7x's two TensorCores.
            dimension_semantics=("parallel",)),
    )(n_real, x_pad, x_pad, w_q, w_kv)

    return qk_pad[:n, :n], out_pad[:n, :OUT_CHS]


def _reference(x, wq, wk, wv, out_chs=OUT_CHS):
    """Pure-JAX reference mirroring the PyTorch forward, evaluated in f32 on
    the same bf16-quantized inputs the kernel's MXU sees."""
    xf = x.astype(jnp.bfloat16).astype(jnp.float32)
    wqf = wq.astype(jnp.bfloat16).astype(jnp.float32)
    wkf = wk.astype(jnp.bfloat16).astype(jnp.float32)
    wvf = wv.astype(jnp.bfloat16).astype(jnp.float32)
    q = xf @ wqf.T
    k = xf @ wkf.T
    v = xf @ wvf.T
    s = (q @ k.T) / math.sqrt(out_chs)
    p = jax.nn.softmax(s, axis=1)
    return p, p @ v


if __name__ == "__main__":
    key = jax.random.PRNGKey(0)
    kx, kq, kk, kv = jax.random.split(key, 4)

    # Deterministic synthetic parameters (nn.Linear weight shape: (out, in)).
    x = jax.random.normal(kx, (N_TOKENS, IN_FEATURES), dtype=jnp.float32)
    wq = jax.random.normal(kq, (OUT_CHS, IN_FEATURES), dtype=jnp.float32) * 0.05
    wk = jax.random.normal(kk, (OUT_CHS, IN_FEATURES), dtype=jnp.float32) * 0.05
    wv = jax.random.normal(kv, (OUT_CHS, IN_FEATURES), dtype=jnp.float32) * 0.05

    # One-time weight preparation (init time).
    w_q, w_kv = jax.block_until_ready(prepare_qkv_weights(wq, wk, wv))

    qk_probs, out = jax.jit(basic_transformer)(x, w_q, w_kv)
    jax.block_until_ready((qk_probs, out))

    qk_exp, out_exp = _reference(x, wq, wk, wv)
    assert qk_probs.shape == (N_TOKENS, N_TOKENS)
    assert out.shape == (N_TOKENS, OUT_CHS)
    # Tolerance budgets bf16 operands on all three matmuls (vs f32 reference)
    # plus the EUP approx reciprocal in the softmax denominator.
    assert jnp.allclose(qk_probs, qk_exp, atol=5e-3, rtol=5e-3)
    assert jnp.allclose(out, out_exp, atol=5e-3, rtol=5e-3)

    print("KERNEL_OK")
</pallas_src>

<mosaic_0001>
module attributes {stable_mosaic.version = 11 : i64} {
  func.func @_transformer_kernel(%arg0: i32, %arg1: memref<1xi32, #tpu.memory_space<smem>>, %arg2: memref<8x128xbf16, #tpu.memory_space<vmem>>, %arg3: memref<128x128xbf16, #tpu.memory_space<vmem>>, %arg4: memref<128x128xbf16, #tpu.memory_space<vmem>>, %arg5: memref<128x256xbf16, #tpu.memory_space<vmem>>, %arg6: memref<8x128xf32, #tpu.memory_space<vmem>>, %arg7: memref<8x128xf32, #tpu.memory_space<vmem>>) attributes {dimension_semantics = [#tpu.dimension_semantics<parallel>], iteration_bounds = array<i64: 1>, scalar_prefetch = 1 : i64, scratch_operands = 0 : i64, tpu.core_type = #tpu.core_type<tc>, window_params = [{transform_indices = @transform_0, window_bounds = array<i64: 8, 128>}, {pipeline_mode = #tpu.pipeline_mode<synchronous>, transform_indices = @transform_1, window_bounds = array<i64: 128, 128>}, {pipeline_mode = #tpu.pipeline_mode<synchronous>, transform_indices = @transform_2, window_bounds = array<i64: 128, 128>}, {pipeline_mode = #tpu.pipeline_mode<synchronous>, transform_indices = @transform_3, window_bounds = array<i64: 128, 256>}, {transform_indices = @transform_4, window_bounds = array<i64: 8, 128>}, {transform_indices = @transform_5, window_bounds = array<i64: 8, 128>}]} {
    %c0 = arith.constant 0 : index
    %0 = memref.load %arg1[%c0] : memref<1xi32, #tpu.memory_space<smem>>
    %c0_0 = arith.constant 0 : index
    %c0_1 = arith.constant 0 : index
    %1 = vector.load %arg2[%c0_0, %c0_1] : memref<8x128xbf16, #tpu.memory_space<vmem>>, vector<8x128xbf16>
    %c0_2 = arith.constant 0 : index
    %c0_3 = arith.constant 0 : index
    %2 = vector.load %arg3[%c0_2, %c0_3] : memref<128x128xbf16, #tpu.memory_space<vmem>>, vector<128x128xbf16>
    %c0_4 = arith.constant 0 : index
    %c0_5 = arith.constant 0 : index
    %3 = vector.load %arg4[%c0_4, %c0_5] : memref<128x128xbf16, #tpu.memory_space<vmem>>, vector<128x128xbf16>
    %cst = arith.constant dense<0.000000e+00> : vector<8x128xf32>
    %4 = tpu.matmul %1, %3, %cst {dimension_numbers = #tpu.dot_dimension_numbers<[1], [0], [0], [1], [0, 0, 1, 1], [], []>} : vector<8x128xbf16>, vector<128x128xbf16>, vector<8x128xf32> -> vector<8x128xf32>
    %c0_6 = arith.constant 0 : index
    %c0_7 = arith.constant 0 : index
    %5 = vector.load %arg5[%c0_6, %c0_7] : memref<128x256xbf16, #tpu.memory_space<vmem>>, vector<128x256xbf16>
    %cst_8 = arith.constant dense<0.000000e+00> : vector<128x256xf32>
    %6 = tpu.matmul %2, %5, %cst_8 {dimension_numbers = #tpu.dot_dimension_numbers<[1], [0], [0], [1], [0, 0, 1, 1], [], []>} : vector<128x128xbf16>, vector<128x256xbf16>, vector<128x256xf32> -> vector<128x256xf32>
    %7 = vector.extract_strided_slice %6 {offsets = [0, 0], sizes = [128, 128], strides = [1, 1]} : vector<128x256xf32> to vector<128x128xf32>
    %8 = vector.extract_strided_slice %6 {offsets = [0, 128], sizes = [128, 128], strides = [1, 1]} : vector<128x256xf32> to vector<128x128xf32>
    %9 = arith.truncf %4 : vector<8x128xf32> to vector<8x128xbf16>
    %10 = arith.truncf %7 : vector<128x128xf32> to vector<128x128xbf16>
    %cst_9 = arith.constant dense<0.000000e+00> : vector<8x128xf32>
    %11 = tpu.matmul %9, %10, %cst_9 {dimension_numbers = #tpu.dot_dimension_numbers<[1], [1], [0], [0], [0, 0, 1, 0], [], []>} : vector<8x128xbf16>, vector<128x128xbf16>, vector<8x128xf32> -> vector<8x128xf32>
    %12 = tpu.iota {dimensions = array<i32: 1>} : vector<8x128xi32>
    %13 = vector.broadcast %0 : i32 to vector<8x128xi32>
    %14 = arith.cmpi slt, %12, %13 : vector<8x128xi32>
    %cst_10 = arith.constant -1.000000e+30 : f32
    %15 = vector.broadcast %cst_10 : f32 to vector<8x128xf32>
    %16 = arith.select %14, %11, %15 : vector<8x128xi1>, vector<8x128xf32>
    %cst_11 = arith.constant dense<0xFF800000> : vector<8xf32>
    %17 = vector.multi_reduction <maximumf>, %16, %cst_11 [1] : vector<8x128xf32> to vector<8xf32>
    %18 = vector.shape_cast %17 : vector<8xf32> to vector<8x1xf32>
    %19 = vector.broadcast %18 : vector<8x1xf32> to vector<8x128xf32>
    %20 = arith.subf %16, %19 : vector<8x128xf32>
    %21 = math.exp %20 : vector<8x128xf32>
    %cst_12 = arith.constant dense<0.000000e+00> : vector<8xf32>
    %22 = vector.multi_reduction <add>, %21, %cst_12 [1] : vector<8x128xf32> to vector<8xf32>
    %23 = vector.shape_cast %22 : vector<8xf32> to vector<8x1xf32>
    %24 = tpu.reciprocal %23 {approx = true} : vector<8x1xf32> -> vector<8x1xf32>
    %25 = vector.broadcast %24 : vector<8x1xf32> to vector<8x128xf32>
    %26 = arith.mulf %21, %25 : vector<8x128xf32>
    %c0_13 = arith.constant 0 : index
    %c0_14 = arith.constant 0 : index
    %27 = vector.load %arg6[%c0_13, %c0_14] : memref<8x128xf32, #tpu.memory_space<vmem>>, vector<8x128xf32>
    tpu.vector_store %arg6[%c0_13, %c0_14], %26 {strides = array<i32>} : memref<8x128xf32, #tpu.memory_space<vmem>>, vector<8x128xf32>,
    %28 = arith.truncf %26 : vector<8x128xf32> to vector<8x128xbf16>
    %29 = arith.truncf %8 : vector<128x128xf32> to vector<128x128xbf16>
    %cst_15 = arith.constant dense<0.000000e+00> : vector<8x128xf32>
    %30 = tpu.matmul %28, %29, %cst_15 {dimension_numbers = #tpu.dot_dimension_numbers<[1], [0], [0], [1], [0, 0, 1, 1], [], []>} : vector<8x128xbf16>, vector<128x128xbf16>, vector<8x128xf32> -> vector<8x128xf32>
    %c0_16 = arith.constant 0 : index
    %c0_17 = arith.constant 0 : index
    %31 = vector.load %arg7[%c0_16, %c0_17] : memref<8x128xf32, #tpu.memory_space<vmem>>, vector<8x128xf32>
    tpu.vector_store %arg7[%c0_16, %c0_17], %30 {strides = array<i32>} : memref<8x128xf32, #tpu.memory_space<vmem>>, vector<8x128xf32>,
    return
  }
  func.func @transform_0(%arg0: i32, %arg1: memref<1xi32, #tpu.memory_space<smem>>) -> (i32, i32) {
    %c0_i32 = arith.constant 0 : i32
    %c0_i32_0 = arith.constant 0 : i32
    return %arg0, %c0_i32 : i32, i32
  }
  func.func @transform_1(%arg0: i32, %arg1: memref<1xi32, #tpu.memory_space<smem>>) -> (i32, i32) {
    %c0_i32 = arith.constant 0 : i32
    %c0_i32_0 = arith.constant 0 : i32
    %c0_i32_1 = arith.constant 0 : i32
    return %c0_i32, %c0_i32_0 : i32, i32
  }
  func.func @transform_2(%arg0: i32, %arg1: memref<1xi32, #tpu.memory_space<smem>>) -> (i32, i32) {
    %c0_i32 = arith.constant 0 : i32
    %c0_i32_0 = arith.constant 0 : i32
    %c0_i32_1 = arith.constant 0 : i32
    return %c0_i32, %c0_i32_0 : i32, i32
  }
  func.func @transform_3(%arg0: i32, %arg1: memref<1xi32, #tpu.memory_space<smem>>) -> (i32, i32) {
    %c0_i32 = arith.constant 0 : i32
    %c0_i32_0 = arith.constant 0 : i32
    %c0_i32_1 = arith.constant 0 : i32
    return %c0_i32, %c0_i32_0 : i32, i32
  }
  func.func @transform_4(%arg0: i32, %arg1: memref<1xi32, #tpu.memory_space<smem>>) -> (i32, i32) {
    %c0_i32 = arith.constant 0 : i32
    %c0_i32_0 = arith.constant 0 : i32
    return %arg0, %c0_i32 : i32, i32
  }
  func.func @transform_5(%arg0: i32, %arg1: memref<1xi32, #tpu.memory_space<smem>>) -> (i32, i32) {
    %c0_i32 = arith.constant 0 : i32
    %c0_i32_0 = arith.constant 0 : i32
    return %arg0, %c0_i32 : i32, i32
  }
}

</mosaic_0001>

<bundles_post_ra>
// kernel: basic_transformer.1
= control target key start
LH: loop header
LB: loop body
LE: loop exit
PB: predicated region body
PF: predicated region fallthrough
CT: control target
= control target key end

     0   :  { %13 = vsyncpa [#allocation5], 0  ;;  %s978_s0 = inlined_call_operand.<no memory space> [shape: s32[1], index: 0, kind: input, shape index: {}]   ;;  %s979_s1 = inlined_call_operand.vmem [shape: bf16[128,128], index: 1, kind: input, shape index: {}, may-alias: {1,2}]   ;;  %s980_s2 = inlined_call_operand.vmem [shape: bf16[128,128], index: 2, kind: input, shape index: {}, may-alias: {1,2}]   ;;  %s981_s3 = inlined_call_operand.vmem [shape: bf16[128,128], index: 3, kind: input, shape index: {}]   ;;  %s982_s4 = inlined_call_operand.hbm [shape: bf16[128,256], index: 4, kind: input, shape index: {}]   ;;  %s983_s5 = inlined_call_operand.hbm [shape: f32[8,128], index: 5, kind: output, shape index: {0}]   ;;  %s984_s6 = inlined_call_operand.hbm [shape: f32[8,128], index: 6, kind: output, shape index: {1}]  }
   0x1   :  { %14 = vsyncpa [#allocation6], 0 }
   0x2   :  { %15 = vsyncpa [#allocation9], 0  ;;  %s803_s21 = smov [#allocation4]   ;;  %s731_s25 = scalar_lea.hbm %s982_s4, 2048 }
   0x3   :  { %s27_s22 = sshll.u32 %s803_s21, 4  ;;  %p732_p0 = scmp.ne.s32.totalorder %s982_s4, %s731_s25  ;;  %s28_s22 = int_to_ptr.vmem [resolvable:$true] %s27_s22 }
   0x4   :  { %p735_p1 = scmp.lt.u32.totalorder %s731_s25, %s982_s4 }
   0x6   :  { %p737_p2 = pnand %p735_p1, %p732_p0 }
   0x8   :  { %740 = shalt.err (!%p737_p2)
}
   0x9   :  { %s741_s30 = scalar_lea.vmem %s28_s22, 2048  ;;  %p746_p4 = scmp.lt.s32.totalorder %s28_s22, %s28_s22 }
   0xa   :  { %p742_p3 = scmp.ne.s32.totalorder %s28_s22, %s741_s30  ;;  %p747_p5 = scmp.lt.s32.totalorder %s741_s30, %s741_s30 }
   0xc   :  { %p748_p6 = por %p747_p5, %p746_p4 }
   0xe   :  { %p749_p7 = pnand %p748_p6, %p742_p3 }
  0x10   :  { %752 = shalt.err (!%p749_p7)
}
  0x11   :  { %s804_s7 = smov 128   ;;  %s805_s8 = smov 8  }
  0x12   :  { %33 = dma.hbm_to_vmem [thread:$0]  %s982_s4, 2048, %s28_s22, [#allocation5], %s804_s7, %s804_s7, %s805_s8  }
  0x13   :  { %797 = dma.done.wait [#allocation5], 2048  }
  0x14   :  { %798 = vsyncadd [#allocation5], 4294965248  ;;  %v806_v0 = vmov 0   ;;  %v807_v1 = vmov 0.0   ;;  %vm808_vm0 = vmmov 0   ;;  %v715_v12 = vld [vmem:[%s981_s3] sm:$0xff]  }
  0x15   :  { %336 = vmatprep.mubr.bf16.mxu1 %v806_v0  ;;  %619 = vmatprep.subr.bf16.mxu0 %v807_v1  ;;  %v687_v2 = vld [vmem:[#allocation4 + $0x4] ss:$8 sps:$4 sm:$0xff]   ;;  %v689_v3 = vld [vmem:[#allocation4] ss:$8 sps:$4 sm:$0xff]   ;;  %v690_v4 = vld [vmem:[#allocation4 + $0x14] ss:$8 sps:$4 sm:$0xff]  }
  0x16   :  { %635 = vmatprep.mubr.msk.bf16.mxu0 %vm808_vm0, %v807_v1  ;;  %304 = vmatprep.subr.bf16.mxu1 %v687_v2  ;;  %v692_v5 = vld [vmem:[#allocation4 + $0x10] ss:$8 sps:$4 sm:$0xff]   ;;  %v693_v6 = vld [vmem:[#allocation4 + $0x24] ss:$8 sps:$4 sm:$0xff]   ;;  %v695_v7 = vld [vmem:[#allocation4 + $0x20] ss:$8 sps:$4 sm:$0xff]  }
  0x17   :  { %305 = vmatpush1.bf16.msra.mxu1 %v689_v3  ;;  %v696_v8 = vld [vmem:[#allocation4 + $0x34] ss:$8 sps:$4 sm:$0xff]   ;;  %v698_v9 = vld [vmem:[#allocation4 + $0x30] ss:$8 sps:$4 sm:$0xff]   ;;  %v699_v10 = vld [vmem:[#allocation4 + $0x44] ss:$8 sps:$4 sm:$0xff]   ;;  %620 = vmatpush3.bf16.msra.mxu0 %v715_v12 }
  0x18   :  { %306 = vmatprep.subr.bf16.mxu1 %v690_v4  ;;  %v701_v11 = vld [vmem:[#allocation4 + $0x40] ss:$8 sps:$4 sm:$0xff]   ;;  %v702_v13 = vld [vmem:[#allocation4 + $0x54] ss:$8 sps:$4 sm:$0xff]   ;;  %621 = vmatprep.subr.bf16.mxu0 %v807_v1  ;;  %v704_v15 = vld [vmem:[#allocation4 + $0x50] ss:$8 sps:$4 sm:$0xff]  }
  0x19   :  { %v717_v14 = vld [vmem:[%s981_s3 + $0x8] sm:$0xff]   ;;  %v718_v17 = vld [vmem:[%s981_s3 + $0x10] sm:$0xff]   ;;  %v720_v20 = vld [vmem:[%s981_s3 + $0x18] sm:$0xff]  }
  0x1a   :  { %v705_v16 = vld [vmem:[#allocation4 + $0x64] ss:$8 sps:$4 sm:$0xff]   ;;  %v707_v18 = vld [vmem:[#allocation4 + $0x60] ss:$8 sps:$4 sm:$0xff]   ;;  %v708_v19 = vld [vmem:[#allocation4 + $0x74] ss:$8 sps:$4 sm:$0xff]  }
  0x1b   :  { %307 = vmatpush1.bf16.msra.mxu1 %v692_v5  ;;  %622 = vmatpush3.bf16.msra.mxu0 %v717_v14  ;;  %v710_v21 = vld [vmem:[#allocation4 + $0x70] ss:$8 sps:$4 sm:$0xff]   ;;  %v721_v22 = vld [vmem:[%s981_s3 + $0x20] sm:$0xff]   ;;  %v723_v24 = vld [vmem:[%s981_s3 + $0x28] sm:$0xff]  }
  0x1c   :  { %308 = vmatprep.subr.bf16.mxu1 %v693_v6  ;;  %623 = vmatprep.subr.bf16.mxu0 %v807_v1  ;;  %v711_v23 = vld [vmem:[%s980_s2] sm:$0xff]   ;;  %v724_v25 = vld [vmem:[%s981_s3 + $0x30] sm:$0xff]   ;;  %v712_v26 = vld [vmem:[%s980_s2 + $0x8] sm:$0xff]  }
  0x1d   :  { %v726_v27 = vld [vmem:[%s981_s3 + $0x38] sm:$0xff]   ;;  %v39_v28 = vld [vmem:[%s979_s1] sm:$0xf]  ;;  %v713_v29 = vld [vmem:[%s980_s2 + $0x10] sm:$0xff]  }
  0x1e   :  { %v714_v30 = vld [vmem:[%s980_s2 + $0x18] sm:$0xff]   ;;  %v716_v31 = vld [vmem:[%s980_s2 + $0x20] sm:$0xff]   ;;  %v719_v32 = vld [vmem:[%s980_s2 + $0x28] sm:$0xff]  }
  0x1f   :  { %309 = vmatpush1.bf16.msra.mxu1 %v695_v7  ;;  %624 = vmatpush3.bf16.msra.mxu0 %v718_v17  ;;  %v722_v33 = vld [vmem:[%s980_s2 + $0x30] sm:$0xff]   ;;  %v725_v34 = vld [vmem:[%s980_s2 + $0x38] sm:$0xff]  }
  0x20   :  { %310 = vmatprep.subr.bf16.mxu1 %v696_v8  ;;  %625 = vmatprep.subr.bf16.mxu0 %v807_v1 }
  0x23   :  { %311 = vmatpush1.bf16.msra.mxu1 %v698_v9  ;;  %626 = vmatpush3.bf16.msra.mxu0 %v720_v20 }
  0x24   :  { %312 = vmatprep.subr.bf16.mxu1 %v699_v10  ;;  %627 = vmatprep.subr.bf16.mxu0 %v807_v1 }
  0x27   :  { %313 = vmatpush1.bf16.msra.mxu1 %v701_v11  ;;  %628 = vmatpush3.bf16.msra.mxu0 %v721_v22 }
  0x28   :  { %314 = vmatprep.subr.bf16.mxu1 %v702_v13  ;;  %629 = vmatprep.subr.bf16.mxu0 %v807_v1 }
  0x2b   :  { %315 = vmatpush1.bf16.msra.mxu1 %v704_v15  ;;  %630 = vmatpush3.bf16.msra.mxu0 %v723_v24 }
  0x2c   :  { %316 = vmatprep.subr.bf16.mxu1 %v705_v16  ;;  %631 = vmatprep.subr.bf16.mxu0 %v807_v1 }
  0x2f   :  { %317 = vmatpush1.bf16.msra.mxu1 %v707_v18  ;;  %632 = vmatpush3.bf16.msra.mxu0 %v724_v25  ;;  %v466_v25 = vlaneseq }
  0x30   :  { %318 = vmatprep.subr.bf16.mxu1 %v708_v19  ;;  %633 = vmatprep.subr.bf16.mxu0 %v807_v1 }
  0x33   :  { %319 = vmatpush1.bf16.msra.mxu1 %v710_v21  ;;  %634 = vmatpush3.bf16.msra.mxu0 %v726_v27  ;;  %v468_v27 = vstv %s978_s0  ;;  %s809_s0 = smov [#allocation7]  }
  0x34   :  { %659 = vmatprep.subr.bf16.mxu1 %v807_v1  ;;  %639 = vmatprep.subr.bf16.mxu0 %v807_v1  ;;  %s537_s18 = sshll.u32 %s809_s0, 4  ;;  %s538_s18 = int_to_ptr.vmem [resolvable:$true] %s537_s18 }
  0x35   :  { %s753_s19 = scalar_lea.vmem %s538_s18, 128  ;;  %p758_p9 = scmp.lt.s32.totalorder %s538_s18, %s538_s18 }
  0x36   :  { %337 = vmatmul.mubr.bf16.vlgmr.msra.gmra.mrb[0].mxu1 %v711_v23  ;;  %636 = vmatmul.mubr.bf16.vlgmr.msra.gmra.mrb[0].mxu0 %v39_v28  ;;  %p754_p8 = scmp.ne.s32.totalorder %s538_s18, %s753_s19  ;;  %p759_p10 = scmp.lt.s32.totalorder %s753_s19, %s753_s19 }
  0x37   :  { %346 = vmatprep.mubr.bf16.mxu1 %v806_v0  ;;  %655 = vmatprep.mubr.msk.bf16.mxu0 %vm808_vm0, %v807_v1 }
  0x38   :  { %p760_p11 = por %p759_p10, %p758_p9 }
  0x3a   :  { %p761_p12 = pnand %p760_p11, %p754_p8 }
  0x3e   :  { %347 = vmatmul.mubr.bf16.gmra.mrb[4].mxu1 %v712_v26  ;;  %v467_v26 = vand.u32 127, %v466_v25 }
  0x3f   :  { %356 = vmatprep.mubr.bf16.mxu1 %v806_v0 }
  0x40   :  { %vm469_vm1 = vcmp.lt.s32.totalorder %v467_v26, %v468_v27 }
  0x46   :  { %357 = vmatmul.mubr.bf16.gmra.mrb[8].mxu1 %v713_v29 }
  0x47   :  { %366 = vmatprep.mubr.bf16.mxu1 %v806_v0 }
  0x4e   :  { %367 = vmatmul.mubr.bf16.gmra.mrb[12].mxu1 %v714_v30 }
  0x4f   :  { %376 = vmatprep.mubr.bf16.mxu1 %v806_v0 }
  0x56   :  { %377 = vmatmul.mubr.bf16.gmra.mrb[16].mxu1 %v716_v31 }
  0x57   :  { %386 = vmatprep.mubr.bf16.mxu1 %v806_v0 }
  0x5e   :  { %387 = vmatmul.mubr.bf16.gmra.mrb[20].mxu1 %v719_v32 }
  0x5f   :  { %396 = vmatprep.mubr.bf16.mxu1 %v806_v0 }
  0x66   :  { %397 = vmatmul.mubr.bf16.gmra.mrb[24].mxu1 %v722_v33 }
  0x67   :  { %406 = vmatprep.mubr.bf16.mxu1 %v806_v0 }
  0x6e   :  { %407 = vmatmul.mubr.bf16.gmra.mrb[28].mxu1 %v725_v34 }
  0x6f   :  { %675 = vmatprep.mubr.msk.bf16.mxu1 %vm808_vm0, %v807_v1 }
 0x109   :  { %v338_v35 = vpop.f32.mrb[0].mxu1  ;;  %v936_v47 = vpop.f32.mrb[0].mxu0 }
 0x10a   :  { %v340_v36 = vpop.f32.mrb[1].mxu1  ;;  %v637_v48 = vpop.f32.mrb[1].mxu0  ;;  %v417_v24 = vpack.c.bf16 %v936_v47, %v936_v47 }
 0x10b   :  { %v342_v37 = vpop.f32.mrb[2].mxu1  ;;  %v157_v50 = vpop.f32.mrb[2].mxu0 }
 0x10c   :  { %v418_v38 = vpack.c.bf16 %v342_v37, %v338_v35  ;;  %v344_v39 = vpop.f32.mrb[3].mxu1  ;;  %v638_v52 = vpop.f32.mrb[3].mxu0 }
 0x10d   :  { %v482_v40 = vpack.c.bf16 %v344_v39, %v340_v36 }
 0x10e   :  { %640 = vmatpush3.bf16.xpose.msra.mxu0 %v418_v38 }
 0x10f   :  { %660 = vmatpush3.bf16.msra.mxu1 %v482_v40  ;;  %641 = vmatprep.subr.bf16.mxu0 %v807_v1 }
 0x110   :  { %661 = vmatprep.subr.bf16.mxu1 %v807_v1 }
 0x111   :  { %v348_v41 = vpop.f32.mrb[4].mxu1 }
 0x112   :  { %v350_v42 = vpop.f32.mrb[5].mxu1 }
 0x113   :  { %v352_v43 = vpop.f32.mrb[6].mxu1 }
 0x114   :  { %v419_v44 = vpack.c.bf16 %v352_v43, %v348_v41  ;;  %v354_v45 = vpop.f32.mrb[7].mxu1 }
 0x115   :  { %v483_v46 = vpack.c.bf16 %v354_v45, %v350_v42 }
 0x116   :  { %642 = vmatpush3.bf16.xpose.msra.mxu0 %v419_v44 }
 0x117   :  { %662 = vmatpush3.bf16.msra.mxu1 %v483_v46  ;;  %643 = vmatprep.subr.bf16.mxu0 %v807_v1 }
 0x118   :  { %663 = vmatprep.subr.bf16.mxu1 %v807_v1 }
 0x119   :  { %v358_v49 = vpop.f32.mrb[8].mxu1 }
 0x11a   :  { %v360_v51 = vpop.f32.mrb[9].mxu1 }
 0x11b   :  { %v362_v53 = vpop.f32.mrb[10].mxu1 }
 0x11c   :  { %v420_v54 = vpack.c.bf16 %v362_v53, %v358_v49  ;;  %v364_v55 = vpop.f32.mrb[11].mxu1 }
 0x11d   :  { %v484_v56 = vpack.c.bf16 %v364_v55, %v360_v51 }
 0x11e   :  { %644 = vmatpush3.bf16.xpose.msra.mxu0 %v420_v54 }
 0x11f   :  { %664 = vmatpush3.bf16.msra.mxu1 %v484_v56  ;;  %645 = vmatprep.subr.bf16.mxu0 %v807_v1 }
 0x120   :  { %665 = vmatprep.subr.bf16.mxu1 %v807_v1 }
 0x121   :  { %v368_v57 = vpop.f32.mrb[12].mxu1 }
 0x122   :  { %v370_v58 = vpop.f32.mrb[13].mxu1 }
 0x123   :  { %v372_v59 = vpop.f32.mrb[14].mxu1 }
 0x124   :  { %v421_v60 = vpack.c.bf16 %v372_v59, %v368_v57  ;;  %v374_v61 = vpop.f32.mrb[15].mxu1 }
 0x125   :  { %v485_v62 = vpack.c.bf16 %v374_v61, %v370_v58 }
 0x126   :  { %646 = vmatpush3.bf16.xpose.msra.mxu0 %v421_v60 }
 0x127   :  { %666 = vmatpush3.bf16.msra.mxu1 %v485_v62  ;;  %647 = vmatprep.subr.bf16.mxu0 %v807_v1 }
 0x128   :  { %667 = vmatprep.subr.bf16.mxu1 %v807_v1 }
 0x129   :  { %v378_v63 = vpop.f32.mrb[16].mxu1 }
 0x12a   :  { %v380_v0 = vpop.f32.mrb[17].mxu1 }
 0x12b   :  { %v382_v2 = vpop.f32.mrb[18].mxu1 }
 0x12c   :  { %v422_v3 = vpack.c.bf16 %v382_v2, %v378_v63  ;;  %v384_v4 = vpop.f32.mrb[19].mxu1 }
 0x12d   :  { %v486_v5 = vpack.c.bf16 %v384_v4, %v380_v0 }
 0x12e   :  { %648 = vmatpush3.bf16.xpose.msra.mxu0 %v422_v3 }
 0x12f   :  { %668 = vmatpush3.bf16.msra.mxu1 %v486_v5  ;;  %649 = vmatprep.subr.bf16.mxu0 %v807_v1 }
 0x130   :  { %669 = vmatprep.subr.bf16.mxu1 %v807_v1 }
 0x131   :  { %v388_v6 = vpop.f32.mrb[20].mxu1 }
 0x132   :  { %v390_v7 = vpop.f32.mrb[21].mxu1 }
 0x133   :  { %v392_v8 = vpop.f32.mrb[22].mxu1 }
 0x134   :  { %v423_v9 = vpack.c.bf16 %v392_v8, %v388_v6  ;;  %v394_v10 = vpop.f32.mrb[23].mxu1 }
 0x135   :  { %v487_v11 = vpack.c.bf16 %v394_v10, %v390_v7 }
 0x136   :  { %650 = vmatpush3.bf16.xpose.msra.mxu0 %v423_v9 }
 0x137   :  { %670 = vmatpush3.bf16.msra.mxu1 %v487_v11  ;;  %651 = vmatprep.subr.bf16.mxu0 %v807_v1 }
 0x138   :  { %671 = vmatprep.subr.bf16.mxu1 %v807_v1 }
 0x139   :  { %v398_v12 = vpop.f32.mrb[24].mxu1 }
 0x13a   :  { %v400_v13 = vpop.f32.mrb[25].mxu1 }
 0x13b   :  { %v402_v14 = vpop.f32.mrb[26].mxu1 }
 0x13c   :  { %v424_v15 = vpack.c.bf16 %v402_v14, %v398_v12  ;;  %v404_v16 = vpop.f32.mrb[27].mxu1 }
 0x13d   :  { %v488_v17 = vpack.c.bf16 %v404_v16, %v400_v13 }
 0x13e   :  { %652 = vmatpush3.bf16.xpose.msra.mxu0 %v424_v15 }
 0x13f   :  { %672 = vmatpush3.bf16.msra.mxu1 %v488_v17  ;;  %653 = vmatprep.subr.bf16.mxu0 %v807_v1 }
 0x140   :  { %673 = vmatprep.subr.bf16.mxu1 %v807_v1 }
 0x141   :  { %v408_v18 = vpop.f32.mrb[28].mxu1 }
 0x142   :  { %v410_v19 = vpop.f32.mrb[29].mxu1 }
 0x143   :  { %v412_v20 = vpop.f32.mrb[30].mxu1 }
 0x144   :  { %v425_v21 = vpack.c.bf16 %v412_v20, %v408_v18  ;;  %v414_v22 = vpop.f32.mrb[31].mxu1 }
 0x145   :  { %v489_v23 = vpack.c.bf16 %v414_v22, %v410_v19 }
 0x146   :  { %654 = vmatpush3.bf16.xpose.msra.mxu0 %v425_v21 }
 0x147   :  { %674 = vmatpush3.bf16.msra.mxu1 %v489_v23 }
 0x14d   :  { %656 = vmatmul.mubr.bf16.vlgmr.msra.gmra.mrb[4].mxu0 %v417_v24 }
 0x220   :  { %v460_v1 = vpop.f32.mrb[4].mxu0 }
 0x221   :  { %v657_v28 = vpop.f32.mrb[5].mxu0  ;;  %v470_v29 = vsel %vm469_vm1, %v460_v1, -1e+30 }
 0x222   :  { %471 = vmax.xlane.f32.xlu0 %v470_v29  ;;  %v463_v30 = vpop.f32.mrb[6].mxu0 }
 0x223   :  { %v658_v31 = vpop.f32.mrb[7].mxu0 }
 0x2af   :  { %v472_v32 = vpop.xlane.xlu0 %471 }
 0x2b0   :  { %v473_v33 = vsub.f32 %v470_v29, %v472_v32 }
 0x2b2   :  { %v474_v34 = vmul.f32 1.442695, %v473_v33 }
 0x2b4   :  { %727 = vpow2.f32 %v474_v34 }
 0x2be   :  { %v728_v35 = vpop.eup %727 }
 0x2bf   :  { %476 = vadd.xlane.f32.xlu0 %v728_v35 }
 0x34c   :  { %v477_v36 = vpop.xlane.xlu0 %476 }
 0x34d   :  { %729 = vrcp.f32 %v477_v36 }
 0x357   :  { %v730_v37 = vpop.eup %729 }
 0x358   :  { %v479_v38 = vmul.f32 %v730_v37, %v728_v35 }
 0x35a   :  { %480 = vst [vmem:[#allocation7] sm:$0xff] %v479_v38  ;;  %v481_v39 = vpack.c.bf16 %v479_v38, %v479_v38 }
 0x35c   :  { %676 = vmatmul.mubr.bf16.vlgmr.msra.gmra.mrb[32].mxu1 %v481_v39 }
 0x35d   :  { %764 = shalt.err (!%p761_p12)
}
 0x35e   :  { %s765_s22 = scalar_lea.hbm %s983_s5, 128 }
 0x35f   :  { %p766_p13 = scmp.ne.s32.totalorder %s983_s5, %s765_s22  ;;  %p769_p0 = scmp.lt.u32.totalorder %s765_s22, %s983_s5 }
 0x361   :  { %p771_p1 = pnand %p769_p0, %p766_p13 }
 0x363   :  { %774 = shalt.err (!%p771_p1)
}
 0x364   :  { %540 = dma.vmem_to_hbm [thread:$0]  %s538_s18, 128, %s983_s5, [#allocation6]  }
 0x365   :  { %s810_s29 = smov [#allocation8]  }
 0x366   :  { %s547_s30 = sshll.u32 %s810_s29, 4  ;;  %s548_s30 = int_to_ptr.vmem [resolvable:$true] %s547_s30 }
 0x367   :  { %s775_s7 = scalar_lea.vmem %s548_s30, 128  ;;  %p780_p3 = scmp.lt.s32.totalorder %s548_s30, %s548_s30 }
 0x368   :  { %p776_p2 = scmp.ne.s32.totalorder %s548_s30, %s775_s7  ;;  %p781_p4 = scmp.lt.s32.totalorder %s775_s7, %s775_s7 }
 0x36a   :  { %p782_p5 = por %p781_p4, %p780_p3 }
 0x36c   :  { %p783_p6 = pnand %p782_p5, %p776_p2 }
 0x42f   :  { %v524_v40 = vpop.f32.mrb[32].mxu1 }
 0x430   :  { %530 = vst [vmem:[#allocation8] sm:$0xff] %v524_v40  ;;  %v677_v41 = vpop.f32.mrb[33].mxu1 }
 0x431   :  { %v527_v42 = vpop.f32.mrb[34].mxu1 }
 0x432   :  { %786 = shalt.err (!%p783_p6)
}
 0x433   :  { %s787_s3 = scalar_lea.hbm %s984_s6, 128 }
 0x434   :  { %p788_p7 = scmp.ne.s32.totalorder %s984_s6, %s787_s3  ;;  %p791_p8 = scmp.lt.u32.totalorder %s787_s3, %s984_s6 }
 0x436   :  { %p793_p9 = pnand %p791_p8, %p788_p7 }
 0x438   :  { %796 = shalt.err (!%p793_p9)
}
 0x439   :  { %550 = dma.vmem_to_hbm [thread:$0]  %s548_s30, 128, %s984_s6, [#allocation9]   ;;  %v678_v43 = vpop.f32.mrb[35].mxu1 }
 0x43a   :  { %799 = dma.done.wait [#allocation6], 128  }
 0x43b   :  { %800 = vsyncadd [#allocation6], 4294967168 }
 0x43c   :  { %801 = dma.done.wait [#allocation9], 128  }
 0x43d   :  { %802 = vsyncadd [#allocation9], 4294967168 }
 0x43e   :  { %557 = vsyncpa [#allocation5], 1 }
 0x43f   :  { %558 = vsyncpa [#allocation6], 1 }
 0x440   :  { %559 = vsyncpa [#allocation9], 1 }

</bundles_post_ra>
